<compile_context>
chip_gen: v7x
topology: tpu7x:2x2x1
jax: 0.10.0
libtpu: 0.0.40
codegen_flags: <defaults>
</compile_context>

<pallas_src>
import jax
import jax.numpy as jnp
from jax.experimental import pallas as pl
from jax.experimental.pallas import tpu as pltpu

D_IN, HID, D_OUT = 1, 20, 1
HPAD = 24           # hidden padded to a sublane multiple of 8 (20 -> 24)
TM_MAX = 2048       # batch lanes per grid step; sweepable 512..8192


def _round_up(a, b):
    return ((a + b - 1) // b) * b


def _mlp_kernel(x_ref, w1_ref, b1_ref, w2t_ref, b2_ref, w3_ref, b3_ref, o_ref):
    # Layout: batch along lanes, hidden along sublanes.
    #   x_ref: (1, TM)         w1/b1/b2/w3: (HPAD, 1)
    #   w2t_ref: (HPAD, HPAD)  b3_ref: (1, 1)     o_ref: (1, TM)
    x = x_ref[...]                                                    # (1, TM)

    # Layer 1 (rank-1, D_IN=1): VPU broadcast multiply-add, tanh on EUP.
    h1 = jnp.tanh(w1_ref[...] * x + b1_ref[...])                      # (HPAD, TM)

    # Layer 2: the only real matmul (tiny LHS) -> MXU.
    h2 = jnp.tanh(
        jnp.dot(w2t_ref[...], h1, preferred_element_type=jnp.float32)
        + b2_ref[...]
    )                                                                 # (HPAD, TM)

    # Layer 3 (rank-1, D_OUT=1): elementwise multiply + sublane reduce.
    o_ref[...] = (
        jnp.sum(h2 * w3_ref[...], axis=0, keepdims=True) + b3_ref[...]
    )                                                                 # (1, TM)


@jax.jit
def pinn_forward(x, params):
    """x: (N, 1) float32 -> (N, 1) float32, matching PyTorch PINN.forward."""
    w1, b1, w2, b2, w3, b3 = params
    n = x.shape[0]

    # Adaptive lane tile: multiple of 128, clamped for small batches.
    tm = min(TM_MAX, _round_up(n, 128))
    n_pad = _round_up(n, tm)

    # Lane-dense input row (1, n_pad); only pad the batch dim.
    x_row = x.reshape(1, n).astype(jnp.float32)
    if n_pad != n:
        x_row = jnp.zeros((1, n_pad), jnp.float32).at[:, :n].set(x_row)

    # Hidden dim along sublanes, zero-padded to HPAD (exact).
    w1_col = jnp.zeros((HPAD, 1), jnp.float32).at[:HID, 0].set(w1[0])      # (24,1)
    b1_col = jnp.zeros((HPAD, 1), jnp.float32).at[:HID, 0].set(b1)         # (24,1)
    w2t_p = jnp.zeros((HPAD, HPAD), jnp.float32).at[:HID, :HID].set(w2.T)  # (24,24)
    b2_col = jnp.zeros((HPAD, 1), jnp.float32).at[:HID, 0].set(b2)         # (24,1)
    w3_col = jnp.zeros((HPAD, 1), jnp.float32).at[:HID, 0].set(w3[:, 0])   # (24,1)
    b3_sc = b3.reshape(1, 1).astype(jnp.float32)                           # (1,1)

    const = lambda i: (0, 0)

    out_row = pl.pallas_call(
        _mlp_kernel,
        out_shape=jax.ShapeDtypeStruct((1, n_pad), jnp.float32),
        grid_spec=pltpu.PrefetchScalarGridSpec(
            num_scalar_prefetch=0,
            grid=(n_pad // tm,),
            in_specs=[
                pl.BlockSpec((1, tm), lambda i: (0, i)),     # x tile (1, TM)
                pl.BlockSpec((HPAD, 1), const),              # w1 column
                pl.BlockSpec((HPAD, 1), const),              # b1 column
                pl.BlockSpec((HPAD, HPAD), const),           # w2^T
                pl.BlockSpec((HPAD, 1), const),              # b2 column
                pl.BlockSpec((HPAD, 1), const),              # w3 column
                pl.BlockSpec((1, 1), const),                 # b3 scalar
            ],
            out_specs=pl.BlockSpec((1, tm), lambda i: (0, i)),
        ),
        compiler_params=pltpu.CompilerParams(
            dimension_semantics=("parallel",),
        ),
    )(x_row, w1_col, b1_col, w2t_p, b2_col, w3_col, b3_sc)

    return out_row[0, :n].reshape(n, D_OUT)


def init_params(key):
    """Deterministic init matching PyTorch nn.Linear default U(-1/sqrt(fan_in), ...)."""
    ks = jax.random.split(key, 6)

    def lin(kw, kb, fan_in, fan_out):
        bound = 1.0 / jnp.sqrt(fan_in)
        w = jax.random.uniform(kw, (fan_in, fan_out), jnp.float32, -bound, bound)
        b = jax.random.uniform(kb, (fan_out,), jnp.float32, -bound, bound)
        return w, b

    w1, b1 = lin(ks[0], ks[1], D_IN, HID)
    w2, b2 = lin(ks[2], ks[3], HID, HID)
    w3, b3 = lin(ks[4], ks[5], HID, D_OUT)
    return (w1, b1, w2, b2, w3, b3)


def reference_forward(x, params):
    w1, b1, w2, b2, w3, b3 = params
    h = jnp.tanh(x @ w1 + b1)
    h = jnp.tanh(h @ w2 + b2)
    return h @ w3 + b3


if __name__ == "__main__":
    key = jax.random.PRNGKey(0)
    kp, kx1, kx2 = jax.random.split(key, 3)
    params = init_params(kp)

    # Small batch (single grid step, tm clamps to 128 with padding).
    x_small = jax.random.uniform(kx1, (8, D_IN), jnp.float32, 0.0, 1.0)
    out_small = jax.block_until_ready(pinn_forward(x_small, params))
    ref_small = reference_forward(x_small, params)
    assert out_small.shape == (8, D_OUT)
    assert jnp.allclose(out_small, ref_small, atol=1e-5, rtol=1e-5), \
        "small-batch mismatch vs reference"

    # Larger batch exercising batch padding (still single big lane tile).
    x_big = jax.random.uniform(kx2, (1000, D_IN), jnp.float32, 0.0, 1.0)
    out_big = jax.block_until_ready(pinn_forward(x_big, params))
    ref_big = reference_forward(x_big, params)
    assert out_big.shape == (1000, D_OUT)
    assert jnp.allclose(out_big, ref_big, atol=1e-5, rtol=1e-5), \
        "large-batch mismatch vs reference"

    # Batch large enough for multiple grid steps (2048-lane tiles).
    x_huge = jax.random.uniform(kx2, (5000, D_IN), jnp.float32, 0.0, 1.0)
    out_huge = jax.block_until_ready(pinn_forward(x_huge, params))
    ref_huge = reference_forward(x_huge, params)
    assert out_huge.shape == (5000, D_OUT)
    assert jnp.allclose(out_huge, ref_huge, atol=1e-5, rtol=1e-5), \
        "multi-tile mismatch vs reference"

    print("KERNEL_OK")
</pallas_src>

<mosaic_0001>
module attributes {stable_mosaic.version = 11 : i64} {
  func.func @_mlp_kernel(%arg0: i32, %arg1: memref<1x128xf32, #tpu.memory_space<vmem>>, %arg2: memref<24x1xf32, #tpu.memory_space<vmem>>, %arg3: memref<24x1xf32, #tpu.memory_space<vmem>>, %arg4: memref<24x24xf32, #tpu.memory_space<vmem>>, %arg5: memref<24x1xf32, #tpu.memory_space<vmem>>, %arg6: memref<24x1xf32, #tpu.memory_space<vmem>>, %arg7: memref<1x1xf32, #tpu.memory_space<vmem>>, %arg8: memref<1x128xf32, #tpu.memory_space<vmem>>) attributes {dimension_semantics = [#tpu.dimension_semantics<parallel>], iteration_bounds = array<i64: 1>, scalar_prefetch = 0 : i64, scratch_operands = 0 : i64, tpu.core_type = #tpu.core_type<tc>, window_params = [{transform_indices = @transform_0, window_bounds = array<i64: 1, 128>}, {pipeline_mode = #tpu.pipeline_mode<synchronous>, transform_indices = @transform_1, window_bounds = array<i64: 24, 1>}, {pipeline_mode = #tpu.pipeline_mode<synchronous>, transform_indices = @transform_2, window_bounds = array<i64: 24, 1>}, {pipeline_mode = #tpu.pipeline_mode<synchronous>, transform_indices = @transform_3, window_bounds = array<i64: 24, 24>}, {pipeline_mode = #tpu.pipeline_mode<synchronous>, transform_indices = @transform_4, window_bounds = array<i64: 24, 1>}, {pipeline_mode = #tpu.pipeline_mode<synchronous>, transform_indices = @transform_5, window_bounds = array<i64: 24, 1>}, {pipeline_mode = #tpu.pipeline_mode<synchronous>, transform_indices = @transform_6, window_bounds = array<i64: 1, 1>}, {transform_indices = @transform_7, window_bounds = array<i64: 1, 128>}]} {
    %c0 = arith.constant 0 : index
    %c0_0 = arith.constant 0 : index
    %0 = vector.load %arg1[%c0, %c0_0] : memref<1x128xf32, #tpu.memory_space<vmem>>, vector<1x128xf32>
    %c0_1 = arith.constant 0 : index
    %c0_2 = arith.constant 0 : index
    %1 = vector.load %arg2[%c0_1, %c0_2] : memref<24x1xf32, #tpu.memory_space<vmem>>, vector<24x1xf32>
    %2 = vector.broadcast %1 : vector<24x1xf32> to vector<24x128xf32>
    %3 = vector.broadcast %0 : vector<1x128xf32> to vector<24x128xf32>
    %4 = arith.mulf %2, %3 : vector<24x128xf32>
    %c0_3 = arith.constant 0 : index
    %c0_4 = arith.constant 0 : index
    %5 = vector.load %arg3[%c0_3, %c0_4] : memref<24x1xf32, #tpu.memory_space<vmem>>, vector<24x1xf32>
    %6 = vector.broadcast %5 : vector<24x1xf32> to vector<24x128xf32>
    %7 = arith.addf %4, %6 : vector<24x128xf32>
    %8 = math.tanh %7 : vector<24x128xf32>
    %c0_5 = arith.constant 0 : index
    %c0_6 = arith.constant 0 : index
    %9 = vector.load %arg4[%c0_5, %c0_6] : memref<24x24xf32, #tpu.memory_space<vmem>>, vector<24x24xf32>
    %cst = arith.constant dense<0.000000e+00> : vector<24x128xf32>
    %10 = tpu.matmul %9, %8, %cst {dimension_numbers = #tpu.dot_dimension_numbers<[1], [0], [0], [1], [0, 0, 1, 1], [], []>} : vector<24x24xf32>, vector<24x128xf32>, vector<24x128xf32> -> vector<24x128xf32>
    %c0_7 = arith.constant 0 : index
    %c0_8 = arith.constant 0 : index
    %11 = vector.load %arg5[%c0_7, %c0_8] : memref<24x1xf32, #tpu.memory_space<vmem>>, vector<24x1xf32>
    %12 = vector.broadcast %11 : vector<24x1xf32> to vector<24x128xf32>
    %13 = arith.addf %10, %12 : vector<24x128xf32>
    %14 = math.tanh %13 : vector<24x128xf32>
    %c0_9 = arith.constant 0 : index
    %c0_10 = arith.constant 0 : index
    %15 = vector.load %arg6[%c0_9, %c0_10] : memref<24x1xf32, #tpu.memory_space<vmem>>, vector<24x1xf32>
    %16 = vector.broadcast %15 : vector<24x1xf32> to vector<24x128xf32>
    %17 = arith.mulf %14, %16 : vector<24x128xf32>
    %cst_11 = arith.constant dense<0.000000e+00> : vector<128xf32>
    %18 = vector.multi_reduction <add>, %17, %cst_11 [0] : vector<24x128xf32> to vector<128xf32>
    %19 = vector.shape_cast %18 : vector<128xf32> to vector<1x128xf32>
    %c0_12 = arith.constant 0 : index
    %c0_13 = arith.constant 0 : index
    %20 = vector.load %arg7[%c0_12, %c0_13] : memref<1x1xf32, #tpu.memory_space<vmem>>, vector<1x1xf32>
    %21 = vector.broadcast %20 : vector<1x1xf32> to vector<1x128xf32>
    %22 = arith.addf %19, %21 : vector<1x128xf32>
    %c0_14 = arith.constant 0 : index
    %c0_15 = arith.constant 0 : index
    %23 = vector.load %arg8[%c0_14, %c0_15] : memref<1x128xf32, #tpu.memory_space<vmem>>, vector<1x128xf32>
    tpu.vector_store %arg8[%c0_14, %c0_15], %22 {strides = array<i32>} : memref<1x128xf32, #tpu.memory_space<vmem>>, vector<1x128xf32>,
    return
  }
  func.func @transform_0(%arg0: i32) -> (i32, i32) {
    %c0_i32 = arith.constant 0 : i32
    %c0_i32_0 = arith.constant 0 : i32
    return %c0_i32, %arg0 : i32, i32
  }
  func.func @transform_1(%arg0: i32) -> (i32, i32) {
    %c0_i32 = arith.constant 0 : i32
    %c0_i32_0 = arith.constant 0 : i32
    %c0_i32_1 = arith.constant 0 : i32
    return %c0_i32, %c0_i32_0 : i32, i32
  }
  func.func @transform_2(%arg0: i32) -> (i32, i32) {
    %c0_i32 = arith.constant 0 : i32
    %c0_i32_0 = arith.constant 0 : i32
    %c0_i32_1 = arith.constant 0 : i32
    return %c0_i32, %c0_i32_0 : i32, i32
  }
  func.func @transform_3(%arg0: i32) -> (i32, i32) {
    %c0_i32 = arith.constant 0 : i32
    %c0_i32_0 = arith.constant 0 : i32
    %c0_i32_1 = arith.constant 0 : i32
    return %c0_i32, %c0_i32_0 : i32, i32
  }
  func.func @transform_4(%arg0: i32) -> (i32, i32) {
    %c0_i32 = arith.constant 0 : i32
    %c0_i32_0 = arith.constant 0 : i32
    %c0_i32_1 = arith.constant 0 : i32
    return %c0_i32, %c0_i32_0 : i32, i32
  }
  func.func @transform_5(%arg0: i32) -> (i32, i32) {
    %c0_i32 = arith.constant 0 : i32
    %c0_i32_0 = arith.constant 0 : i32
    %c0_i32_1 = arith.constant 0 : i32
    return %c0_i32, %c0_i32_0 : i32, i32
  }
  func.func @transform_6(%arg0: i32) -> (i32, i32) {
    %c0_i32 = arith.constant 0 : i32
    %c0_i32_0 = arith.constant 0 : i32
    %c0_i32_1 = arith.constant 0 : i32
    return %c0_i32, %c0_i32_0 : i32, i32
  }
  func.func @transform_7(%arg0: i32) -> (i32, i32) {
    %c0_i32 = arith.constant 0 : i32
    %c0_i32_0 = arith.constant 0 : i32
    return %c0_i32, %arg0 : i32, i32
  }
}

</mosaic_0001>

<bundles_post_ra>
// kernel: pinn_forward.1
= control target key start
LH: loop header
LB: loop body
LE: loop exit
PB: predicated region body
PF: predicated region fallthrough
CT: control target
= control target key end

     0   :  { %v289_v0 = vmov 0   ;;  %v290_v15 = vmov 0.0|0.0   ;;  %vm291_vm0 = vmmov 0   ;;  %v292_v16 = vmov 0.0   ;;  %s390_s2 = inlined_call_operand.vmem [shape: f32[24,1], index: 2, kind: input, shape index: {}]   ;;  %s391_s1 = inlined_call_operand.vmem [shape: f32[24,1], index: 1, kind: input, shape index: {}]   ;;  %s392_s6 = inlined_call_operand.<no memory space> [shape: f32[1,1], index: 6, kind: input, shape index: {}]   ;;  %s393_s4 = inlined_call_operand.vmem [shape: f32[24,1], index: 4, kind: input, shape index: {}]   ;;  %s394_s5 = inlined_call_operand.vmem [shape: f32[24,1], index: 5, kind: input, shape index: {}]   ;;  %s395_s0 = inlined_call_operand.vmem [shape: f32[1,128], index: 0, kind: input, shape index: {}]   ;;  %s396_s3 = inlined_call_operand.vmem [shape: f32[24,24], index: 3, kind: input, shape index: {}]   ;;  %s397_s7 = inlined_call_operand.vmem [shape: f32[1,128], index: 7, kind: output, shape index: {}]  }
   0x1   :  { %276 = vset.pattern.permute.xlu1 %v289_v0  ;;  %275 = vset.pattern.permute.xlu0 %v289_v0  ;;  %v56_v1 = vld [vmem:[%s390_s2] sm:$0xff]  ;;  %v12_v3 = vstv %s392_s6  ;;  %v57_v4 = vld [vmem:[%s390_s2 + $0x8] sm:$0xff]  ;;  %v58_v6 = vld [vmem:[%s390_s2 + $0x10] sm:$0xff]  ;;  %vm101_vm1 = vcmask 195584   ;;  %v229_v59 = vlaneseq }
   0x2   :  { %v29_v2 = vld [vmem:[%s391_s1] sm:$0xff]  ;;  %61 = vperm.xlu1 %276, %v56_v1   ;;  %13 = vst [vmem:[#allocation2] sm:$0x1] %v12_v3  ;;  %v30_v5 = vld [vmem:[%s391_s1 + $0x8] sm:$0xff]  ;;  %v31_v7 = vld [vmem:[%s391_s1 + $0x10] sm:$0xff]  ;;  %264 = vmatprep.subr.bf16.mxu0 %v290_v15 }
   0x3   :  { %34 = vperm.xlu0 %275, %v29_v2   ;;  %v84_v8 = vld [vmem:[%s393_s4 + $0x8] sm:$0xff]  ;;  %v83_v9 = vld [vmem:[%s393_s4] sm:$0xff]  ;;  %v85_v11 = vld [vmem:[%s393_s4 + $0x10] sm:$0xff]  ;;  %267 = vmatprep.subr.bf16.mxu1 %v290_v15  ;;  %v230_v62 = vshrl.u32 %v229_v59, 7 }
   0x4   :  { %v194_v10 = vld [vmem:[%s394_s5] sm:$0xff]  ;;  %v196_v12 = vld [vmem:[%s394_s5 + $0x10] sm:$0xff]  ;;  %v195_v13 = vld [vmem:[%s394_s5 + $0x8] sm:$0xff]  ;;  %255 = vmatprep.mubr.msk.f32.mxu0 %vm291_vm0, %v292_v16  ;;  %258 = vmatprep.mubr.msk.f32.mxu1 %vm291_vm0, %v292_v16 }
   0x5   :  { %v239_v17 = vld [vmem:[%s395_s0] ss:$0 sm:$0xff]  ;;  %v81_v34 = vld [vmem:[%s396_s3 + $0x8] sm:$0xff]  ;;  %v82_v36 = vld [vmem:[%s396_s3 + $0x10] sm:$0xff]  ;;  %v231_v1 = vsub.s32 0, %v230_v62 }
   0x6   :  { %66 = vperm.xlu1 %276, %v57_v4   ;;  %v80_v33 = vld [vmem:[%s396_s3] sm:$0xff] }
   0x7   :  { %39 = vperm.xlu0 %275, %v30_v5  }
   0x9   :  { %v223_v14 = vld [vmem:[#allocation2] sm:$0x1] }
   0xa   :  { %71 = vperm.xlu1 %276, %v58_v6  }
   0xb   :  { %44 = vperm.xlu0 %275, %v31_v7  }
   0xe   :  { %93 = vperm.xlu1 %276, %v84_v8  }
   0xf   :  { %88 = vperm.xlu0 %275, %v83_v9  }
  0x12   :  { %199 = vperm.xlu1 %276, %v194_v10  }
  0x13   :  { %98 = vperm.xlu0 %275, %v85_v11  }
  0x16   :  { %209 = vperm.xlu1 %276, %v196_v12  }
  0x17   :  { %204 = vperm.xlu0 %275, %v195_v13  }
  0x1b   :  { %226 = vperm.xlu0 %275, %v223_v14  }
  0x81   :  { %v62_v18 = vpop.permute.xlu1 %61 }
  0x82   :  { %v35_v19 = vpop.permute.xlu0 %34 }
  0x83   :  { %v53_v20 = vmul.f32 %v239_v17, %v35_v19 }
  0x85   :  { %v74_v21 = vadd.f32 %v62_v18, %v53_v20  ;;  %v67_v22 = vpop.permute.xlu1 %66 }
  0x86   :  { %v40_v23 = vpop.permute.xlu0 %39 }
  0x87   :  { %v54_v24 = vmul.f32 %v239_v17, %v40_v23  ;;  %277 = vtanh.f32 %v74_v21 }
  0x89   :  { %v75_v25 = vadd.f32 %v67_v22, %v54_v24  ;;  %v72_v28 = vpop.permute.xlu1 %71 }
  0x8a   :  { %v45_v26 = vpop.permute.xlu0 %44 }
  0x8b   :  { %279 = vtanh.f32 %v75_v25  ;;  %v55_v27 = vmul.f32 %v239_v17, %v45_v26 }
  0x8d   :  { %v76_v29 = vadd.f32 %v72_v28, %v55_v27  ;;  %v94_v38 = vpop.permute.xlu1 %93 }
  0x8e   :  { %v89_v37 = vpop.permute.xlu0 %88 }
  0x8f   :  { %281 = vtanh.f32 %v76_v29 }
  0x91   :  { %v278_v30 = vpop.eup %277  ;;  %v200_v49 = vpop.permute.xlu1 %199 }
  0x92   :  { %v99_v45 = vpop.permute.xlu0 %98 }
  0x95   :  { %v280_v31 = vpop.eup %279  ;;  %v210_v56 = vpop.permute.xlu1 %209 }
  0x96   :  { %v265_v32 = vpack.c.bf16 %v280_v31, %v278_v30  ;;  %v205_v52 = vpop.permute.xlu0 %204 }
  0x98   :  { %266 = vmatpush3.bf16.msra.mxu0 %v265_v32  ;;  %269 = vmatpush3.bf16.msra.mxu1 %v265_v32 }
  0x99   :  { %253 = vmatprep.subr.mxu0 %v292_v16  ;;  %268 = vmatprep.subr.mxu1 %v292_v16  ;;  %v282_v35 = vpop.eup %281 }
  0x9a   :  { %v227_v3 = vpop.permute.xlu0 %226 }
  0x9b   :  { %v232_v5 = vrot.slane %v227_v3, %v231_v1 }
  0x9c   :  { %254 = vmatpush3.msra.mxu0 %v282_v35  ;;  %270 = vmatpush3.msra.mxu1 %v282_v35 }
  0x9d   :  { %256 = vmatmul.mubr.msk.f32.vlgmr.msra.gmra.mrb[0].mxu0 %vm101_vm1, %v80_v33  ;;  %259 = vmatmul.mubr.msk.f32.vlgmr.msra.gmra.mrb[0].mxu1 %vm101_vm1, %v81_v34 }
  0x9e   :  { %261 = vmatprep.mubr.msk.f32.mxu1 %vm291_vm0, %v292_v16 }
  0xa1   :  { %262 = vmatmul.mubr.msk.f32.gmra.mrb[2].mxu1 %vm101_vm1, %v82_v36 }
 0x170   :  { %v177_v39 = vpop.f32.mrb[0].mxu0  ;;  %v182_v40 = vpop.f32.mrb[0].mxu1 }
 0x171   :  { %v178_v41 = vadd.f32 %v177_v39, %v89_v37  ;;  %v183_v42 = vadd.f32 %v182_v40, %v94_v38  ;;  %v260_v43 = vpop.f32.mrb[1].mxu1  ;;  %v257_v44 = vpop.f32.mrb[1].mxu0 }
 0x173   :  { %283 = vtanh.f32 %v178_v41 }
 0x174   :  { %285 = vtanh.f32 %v183_v42  ;;  %v187_v46 = vpop.f32.mrb[2].mxu1 }
 0x175   :  { %v188_v47 = vadd.f32 %v187_v46, %v99_v45  ;;  %v263_v48 = vpop.f32.mrb[3].mxu1 }
 0x177   :  { %287 = vtanh.f32 %v188_v47 }
 0x17d   :  { %v284_v50 = vpop.eup %283 }
 0x17e   :  { %v286_v51 = vpop.eup %285  ;;  %v212_v53 = vmul.f32 %v284_v50, %v200_v49 }
 0x17f   :  { %v213_v54 = vmul.f32 %v286_v51, %v205_v52 }
 0x181   :  { %v288_v55 = vpop.eup %287  ;;  %v215_v57 = vadd.f32 %v213_v54, %v212_v53 }
 0x182   :  { %v214_v58 = vmul.f32 %v288_v55, %v210_v56 }
 0x184   :  { %v216_v60 = vadd.f32 %v215_v57, %v214_v58 }
 0x186   :  { %v217_v61 = vrot.slane %v216_v60, 4 }
 0x188   :  { %v218_v63 = vadd.f32 %v217_v61, %v216_v60 }
 0x18a   :  { %v219_v0 = vrot.slane %v218_v63, 2 }
 0x18c   :  { %v220_v2 = vadd.f32 %v219_v0, %v218_v63 }
 0x18e   :  { %v221_v4 = vrot.slane %v220_v2, 1 }
 0x190   :  { %v222_v6 = vadd.f32 %v221_v4, %v220_v2 }
 0x192   :  { %v233_v7 = vadd.f32 %v232_v5, %v222_v6 }
 0x194   :  { %234 = vst [vmem:[%s397_s7] sm:$0x1] %v233_v7 }

</bundles_post_ra>
